<compile_context>
chip_gen: v7x
topology: tpu7x:2x2x1
jax: 0.10.0
libtpu: 0.0.40
codegen_flags: <defaults>
</compile_context>

<pallas_src>
import jax
import jax.numpy as jnp
from jax.experimental import pallas as pl
from jax.experimental.pallas import tpu as pltpu


def _linear_kernel(x_ref, w_ref, b_ref, o_ref):
    # x_ref: (TM, D)  w_ref: (D, TN)  b_ref: (1, TN)  o_ref: (TM, TN)
    acc = jnp.dot(x_ref[...], w_ref[...], preferred_element_type=jnp.float32)
    o_ref[...] = (acc + b_ref[...].astype(jnp.float32)).astype(o_ref.dtype)


def _round_up(v, m):
    return ((v + m - 1) // m) * m


def _vmem_budget_bytes():
    """~65% of physical VMEM: ~83 MiB on v5e/v6e (128 MiB), ~42 MiB on v7x (64 MiB)."""
    try:
        cap = int(pltpu.get_tpu_info().vmem_capacity_bytes)
    except Exception:
        cap = 64 * 1024 * 1024  # conservative fallback (v7x-sized)
    return int(cap * 0.65)


def _choose_tiles(m, d, n_pad, itemsize, budget):
    """Pick (tm, tn) so single-buffered W + double-buffered x/out fit `budget`."""
    # Minimum sublane multiple: 8 rows for 4-byte dtypes, 16 for 2-byte, 32 for 1-byte.
    sub = max(8, 32 // max(itemsize, 1))

    # N tile: the resident weight tile (D x tn, single-buffered) gets at most
    # ~half the budget; the streaming x / out tiles get the rest.
    max_tn_elems = (budget // 2) // max(d * itemsize, 1)
    max_tn = max(128, (max_tn_elems // 128) * 128)
    tn = min(n_pad, max_tn)

    # M tile from the remaining budget: double-buffered x (tm x D) + out (tm x tn).
    w_bytes = (d * tn + tn) * itemsize  # weight + bias, single buffer
    per_row = 2 * (d + tn) * itemsize
    remaining = max(budget - w_bytes, sub * per_row)
    tm = remaining // per_row
    tm = max(sub, min(1024, (tm // sub) * sub))
    tm = min(tm, _round_up(m, sub))

    # Keep >= 2 M-steps when possible so the "parallel" axis can shard across
    # v7x's two TensorCores (harmless on 1-TC chips: ~0.35us extra per step).
    if pl.cdiv(m, tm) < 2 and m > sub:
        tm = max(sub, _round_up(pl.cdiv(m, 2), sub))
    return tm, tn


@jax.jit
def classification_head(x, w_t, b):
    """y = x @ w_t + b  (== torch nn.Linear with weight = w_t.T, bias = b).

    x:   [..., model_dim]
    w_t: [model_dim, num_labels]
    b:   [num_labels]
    """
    *lead, model_dim = x.shape
    num_labels = w_t.shape[1]

    m = 1
    for dim in lead:
        m *= dim
    x2d = x.reshape(m, model_dim)

    # --- Pad the label (lane) dimension to a multiple of 128 for lane-dense,
    # unmasked stores and full MXU output columns (weight/bias only; tiny). ---
    n_pad = _round_up(max(num_labels, 1), 128)
    if n_pad != num_labels:
        w_p = jnp.pad(w_t, ((0, 0), (0, n_pad - num_labels)))
        b_p = jnp.pad(b, (0, n_pad - num_labels))
    else:
        w_p, b_p = w_t, b
    b2d = b_p.reshape(1, n_pad)

    itemsize = jnp.dtype(x.dtype).itemsize
    budget = _vmem_budget_bytes()
    tm, tn = _choose_tiles(m, model_dim, n_pad, itemsize, budget)

    grid_m = pl.cdiv(m, tm)       # ragged tail M block is masked by Pallas
    grid_n = pl.cdiv(n_pad, tn)
    # N outermost so the weight tile stays resident across the inner M sweep.
    grid = (grid_n, grid_m)

    # Actual per-step VMEM footprint (W/bias single-buffered, x/out double-buffered).
    footprint = (
        (model_dim * tn + tn) * jnp.dtype(w_p.dtype).itemsize
        + 2 * tm * model_dim * itemsize
        + 2 * tm * tn * itemsize
    )
    vmem_limit = int(max(budget, footprint + (2 << 20)))

    flops = 2 * m * model_dim * n_pad
    bytes_accessed = (
        grid_n * m * model_dim * itemsize                       # x read (once per N sweep)
        + model_dim * n_pad * jnp.dtype(w_p.dtype).itemsize     # W read once (resident)
        + n_pad * jnp.dtype(b_p.dtype).itemsize                 # bias read once
        + m * n_pad * itemsize                                  # out write
    )

    out2d = pl.pallas_call(
        _linear_kernel,
        out_shape=jax.ShapeDtypeStruct((m, n_pad), x.dtype),
        grid_spec=pl.GridSpec(
            grid=grid,
            in_specs=[
                # x tile streams along M (double-buffered by default).
                pl.BlockSpec((tm, model_dim), lambda j, i: (i, 0)),
                # Weight / bias: block index constant within an N sweep ->
                # single buffer, DMAed only when the N tile changes.
                pl.BlockSpec((model_dim, tn), lambda j, i: (0, j),
                             pipeline_mode=pl.Buffered(1)),
                pl.BlockSpec((1, tn), lambda j, i: (0, j),
                             pipeline_mode=pl.Buffered(1)),
            ],
            out_specs=pl.BlockSpec((tm, tn), lambda j, i: (i, j)),
        ),
        compiler_params=pltpu.CompilerParams(
            dimension_semantics=("parallel", "parallel"),
            vmem_limit_bytes=vmem_limit,
        ),
        cost_estimate=pl.CostEstimate(
            flops=flops, transcendentals=0, bytes_accessed=bytes_accessed
        ),
    )(x2d, w_p, b2d)

    # Rows are already exactly m; only the padded label columns are sliced off.
    out = out2d[:, :num_labels] if n_pad != num_labels else out2d
    return out.reshape(*lead, num_labels)


if __name__ == "__main__":
    # Small shapes consistent with the module's forward:
    # batch=2, seq=8, model_dimension=32, num_labels=10
    batch, seq, model_dimension, num_labels = 2, 8, 32, 10

    key = jax.random.PRNGKey(0)
    kx, kw, kb = jax.random.split(key, 3)

    x = jax.random.normal(kx, (batch, seq, model_dimension), dtype=jnp.float32)

    # Deterministic nn.Linear-style init: U(-1/sqrt(fan_in), 1/sqrt(fan_in)).
    bound = 1.0 / (model_dimension ** 0.5)
    # w_t is [model_dim, num_labels] == PyTorch weight.T
    w_t = jax.random.uniform(
        kw, (model_dimension, num_labels), dtype=jnp.float32,
        minval=-bound, maxval=bound)
    b = jax.random.uniform(
        kb, (num_labels,), dtype=jnp.float32, minval=-bound, maxval=bound)

    y = classification_head(x, w_t, b)
    y = jax.block_until_ready(y)

    # Reference check against plain JAX (same semantics as torch nn.Linear).
    y_ref = x @ w_t + b
    assert y.shape == (batch, seq, num_labels)
    assert jnp.allclose(y, y_ref, atol=1e-5, rtol=1e-5)

    print("KERNEL_OK")
</pallas_src>

<mosaic_0001>
module attributes {stable_mosaic.version = 11 : i64} {
  func.func @_linear_kernel(%arg0: i32, %arg1: i32, %arg2: memref<8x32xf32, #tpu.memory_space<vmem>>, %arg3: memref<32x128xf32, #tpu.memory_space<vmem>>, %arg4: memref<1x128xf32, #tpu.memory_space<vmem>>, %arg5: memref<8x128xf32, #tpu.memory_space<vmem>>) attributes {dimension_semantics = [#tpu.dimension_semantics<parallel>, #tpu.dimension_semantics<parallel>], iteration_bounds = array<i64: 1, 2>, scalar_prefetch = 0 : i64, scratch_operands = 0 : i64, tpu.core_type = #tpu.core_type<tc>, window_params = [{transform_indices = @transform_0, window_bounds = array<i64: 8, 32>}, {pipeline_mode = #tpu.pipeline_mode<synchronous>, transform_indices = @transform_1, window_bounds = array<i64: 32, 128>}, {pipeline_mode = #tpu.pipeline_mode<synchronous>, transform_indices = @transform_2, window_bounds = array<i64: 1, 128>}, {transform_indices = @transform_3, window_bounds = array<i64: 8, 128>}]} {
    %c0 = arith.constant 0 : index
    %c0_0 = arith.constant 0 : index
    %0 = vector.load %arg2[%c0, %c0_0] : memref<8x32xf32, #tpu.memory_space<vmem>>, vector<8x32xf32>
    %c0_1 = arith.constant 0 : index
    %c0_2 = arith.constant 0 : index
    %1 = vector.load %arg3[%c0_1, %c0_2] : memref<32x128xf32, #tpu.memory_space<vmem>>, vector<32x128xf32>
    %cst = arith.constant dense<0.000000e+00> : vector<8x128xf32>
    %2 = tpu.matmul %0, %1, %cst {dimension_numbers = #tpu.dot_dimension_numbers<[1], [0], [0], [1], [0, 0, 1, 1], [], []>} : vector<8x32xf32>, vector<32x128xf32>, vector<8x128xf32> -> vector<8x128xf32>
    %c0_3 = arith.constant 0 : index
    %c0_4 = arith.constant 0 : index
    %3 = vector.load %arg4[%c0_3, %c0_4] : memref<1x128xf32, #tpu.memory_space<vmem>>, vector<1x128xf32>
    %4 = vector.broadcast %3 : vector<1x128xf32> to vector<8x128xf32>
    %5 = arith.addf %2, %4 : vector<8x128xf32>
    %c0_5 = arith.constant 0 : index
    %c0_6 = arith.constant 0 : index
    %6 = vector.load %arg5[%c0_5, %c0_6] : memref<8x128xf32, #tpu.memory_space<vmem>>, vector<8x128xf32>
    tpu.vector_store %arg5[%c0_5, %c0_6], %5 {strides = array<i32>} : memref<8x128xf32, #tpu.memory_space<vmem>>, vector<8x128xf32>,
    return
  }
  func.func @transform_0(%arg0: i32, %arg1: i32) -> (i32, i32) {
    %c0_i32 = arith.constant 0 : i32
    %c0_i32_0 = arith.constant 0 : i32
    return %arg1, %c0_i32 : i32, i32
  }
  func.func @transform_1(%arg0: i32, %arg1: i32) -> (i32, i32) {
    %c0_i32 = arith.constant 0 : i32
    %c0_i32_0 = arith.constant 0 : i32
    return %c0_i32, %arg0 : i32, i32
  }
  func.func @transform_2(%arg0: i32, %arg1: i32) -> (i32, i32) {
    %c0_i32 = arith.constant 0 : i32
    %c0_i32_0 = arith.constant 0 : i32
    return %c0_i32, %arg0 : i32, i32
  }
  func.func @transform_3(%arg0: i32, %arg1: i32) -> (i32, i32) {
    %c0_i32 = arith.constant 0 : i32
    return %arg1, %arg0 : i32, i32
  }
}

</mosaic_0001>

<bundles_post_ra>
// kernel: classification_head.1
= control target key start
LH: loop header
LB: loop body
LE: loop exit
PB: predicated region body
PF: predicated region fallthrough
CT: control target
= control target key end

     0   :  { %s512_s12 = smov 0   ;;  %s514_s13 = smov 0   ;;  %s560_s0 = inlined_call_operand.vmem [shape: f32[16,32], index: 0, kind: input, shape index: {}]   ;;  %s561_s1 = inlined_call_operand.vmem [shape: f32[32,128], index: 1, kind: input, shape index: {}]   ;;  %s562_s2 = inlined_call_operand.vmem [shape: f32[1,128], index: 2, kind: input, shape index: {}]   ;;  %s563_s3 = inlined_call_operand.vmem [shape: f32[16,128], index: 3, kind: output, shape index: {}]  }
   0x1   :  { %s516_s14 = smov 0  }
   0x2 LB: > { %s22_s15 = sadd.s32 1, %s483_s13  ;;  %p409_p0 = scmp.ge.s32.totalorder %s487_s14, 1  ;;  %s487_s14 = sphi %s516_s14, %s13_s14   ;;  %s483_s13 = sphi %s514_s13, %s565_s13   ;;  %s479_s12 = sphi %s512_s12, %s564_s12  }
   0x3   : > { %p23_p1 = scmp.ge.s32.totalorder %s22_s15, 2  ;;  %p167_p2 = scmp.lt.s32.totalorder %s487_s14, 3 }
   0x5   : > { %s567_s15 = smov (%p23_p1, %s22_s15), 0  ;;  %p168_p3 = pnand %p409_p0, %p167_p2 }
   0x6   : > { %v218_v0 = vld [vmem:[%s561_s1] sm:$0xff] (!%p168_p3)  ;;  %v219_v1 = vld [vmem:[%s561_s1 + $0x8] sm:$0xff] (!%p168_p3)  ;;  %v220_v2 = vld [vmem:[%s561_s1 + $0x10] sm:$0xff] (!%p168_p3)  ;;  %v489_v3 = vmov (!%p168_p3), 0.0|0.0   ;;  %vm490_vm0 = vmmov (!%p168_p3), 0   ;;  %v491_v6 = vmov (!%p168_p3), 0.0  }
   0x7   : > { %171 = sbr.rel (%p168_p3) target bundleno = 233 (0xe9), region = 32  ;;  %432 = vmatprep.subr.bf16.mxu0 (!%p168_p3), %v489_v3  ;;  %v433_v4 = vpack.c.bf16 (!%p168_p3), %v219_v1, %v218_v0  ;;  %v221_v5 = vld [vmem:[%s561_s1 + $0x18] sm:$0xff] (!%p168_p3)  ;;  %429 = vmatprep.mubr.msk.f32.mxu0 (!%p168_p3), %vm490_vm0, %v491_v6  ;;  %p199_p4 = scmp.lt.s32.totalorder (!%p168_p3), %s479_s12, 1  ;;  %vm229_vm1 = vcmask (!%p168_p3), 261120   ;;  %v412_v9 = vld [vmem:[%s562_s2] ss:$0 sm:$0xff] (!%p168_p3) }
   0x8   : > { %v436_v7 = vpack.c.bf16 (!%p168_p3), %v221_v5, %v220_v2 }
   0x9   : > { %434 = vmatpush3.bf16.msra.mxu0 (!%p168_p3), %v433_v4 }
   0xa   : > { %435 = vmatprep.subr.bf16.mxu0 (!%p168_p3), %v489_v3 }
   0xd   : > { %437 = vmatpush3.bf16.msra.mxu0 (!%p168_p3), %v436_v7 }
   0xe   : > { %s569_s12 = smov (!%p199_p4, %s479_s12), 1 }
   0xf   : > { %s410_s24 = sshll.u32 %s569_s12, 3 }
  0x10   : > { %s202_s27 = scalar_lea.vmem %s560_s0, %s410_s24  ;;  %s216_s5 = scalar_lea.vmem %s563_s3, %s410_s24 }
  0x11   : > { %v217_v8 = vld [vmem:[%s202_s27] sm:$0xff] }
  0x12   : > { %430 = vmatmul.mubr.msk.f32.vlgmr.msra.gmra.mrb[0].mxu0 %vm229_vm1, %v217_v8 }
  0xe5   : > { %v299_v10 = vpop.f32.mrb[0].mxu0 }
  0xe6   : > { %v300_v11 = vadd.f32 %v412_v9, %v299_v10  ;;  %v431_v12 = vpop.f32.mrb[1].mxu0 }
  0xe8   : > { %303 = vst [vmem:[%s216_s5] sm:$0xff] %v300_v11 }
  0xe9 PF: > { %s13_s14 = sadd.s32 1, %s487_s14   ;;  %s564_s12 = smov %s483_s13 }
  0xea   : > { %p10_p5 = scmp.ge.s32.totalorder %s13_s14, 4   ;;  %s565_s13 = smov %s567_s15 }
  0xec   :  { %12 = sbr.rel (!%p10_p5) target bundleno = 2 (0x2), region = 68 }

</bundles_post_ra>
